<compile_context>
chip_gen: v6e
topology: v6e:2x2x1
jax: 0.10.0
libtpu: 0.0.40
codegen_flags: <defaults>
</compile_context>

<pallas_src>
import functools

import jax
import jax.numpy as jnp
from jax.experimental import pallas as pl
from jax.experimental.pallas import tpu as pltpu


def _round_up(x, m):
    return (x + m - 1) // m * m


def _vmem_capacity_bytes():
    try:
        return int(pltpu.get_tpu_info().vmem_capacity_bytes)
    except Exception:
        return 64 * 1024 * 1024  # conservative (v7x) fallback


def _pick_tiles(H, W, CH, K):
    """Pick (H_t, K_t, vmem_limit_bytes) from the device's VMEM capacity."""
    vmem_cap = _vmem_capacity_bytes()
    budget = (vmem_cap * 3) // 5            # ~60%: pipeline + Mosaic scratch headroom

    # H tile: multiple of 8 that divides H (halving keeps divisibility), bounding
    # the double-buffered image block to ~1/3 of the budget.  Odd H falls back to
    # a single full-H block (block == full dim satisfies the (8,128) rule).
    h_t = H
    if H % 8 == 0:
        while 2 * (2 * CH * h_t * W * 4) > budget // 3 and h_t % 16 == 0:
            h_t //= 2
    if H % h_t != 0:
        h_t = H

    # K tile: bound in-kernel temporaries + phase tables + double-buffered
    # traj/out blocks with what is left after the image residency.
    img_resident = 2 * (2 * CH * h_t * W * 4)
    per_k = (6 * CH * h_t            # matmul results + combined complex partials
             + 2 * (W + h_t)         # cy/sy/cx/sx phase tables
             + 2 * (2 * CH)          # double-buffered output block
             + 2 * 2                 # double-buffered traj block
             ) * 4
    avail = max(budget - img_resident, 128 * per_k)
    k_t = max(128, (avail // per_k) // 128 * 128)
    if k_t >= 256:
        k_t = (k_t // 256) * 256     # MXU-native N on v6e/v7x (2x256x256)
    k_t = int(min(k_t, 2048, _round_up(K, 128)))

    vmem_limit = int(min(vmem_cap * 3 // 4, 112 * 1024 * 1024))
    return h_t, k_t, vmem_limit


def _nufft_kernel(traj_ref, img_ref, out_ref, *, H, W, CH):
    """One (batch*phase, k-tile, h-tile) grid step.

    traj_ref : (1, 2, K_t)          kx (row-coord freq) / ky (col-coord freq)
    img_ref  : (1, 2, CH, H_t, W)   [0]=Re(image), [1]=Im(image)
    out_ref  : (1, 2, CH, K_t)      [0]=Re(kspace), [1]=Im(kspace); accumulator
                                    resident across the innermost H axis.
    """
    h = pl.program_id(2)
    n_h = pl.num_programs(2)
    H_t = img_ref.shape[3]
    K_t = traj_ref.shape[2]

    @pl.when(h == 0)
    def _init():
        out_ref[...] = jnp.zeros_like(out_ref)

    traj = traj_ref[0]                               # (2, K_t)
    kx = traj[0:1, :]                                # (1, K_t)
    ky = traj[1:2, :]                                # (1, K_t)

    # W-axis phase tables (EUP): cos/sin(ky * y_j), y_j centered.
    yj = (jax.lax.broadcasted_iota(jnp.int32, (W, K_t), 0) - (W // 2)).astype(jnp.float32)
    py = yj * ky
    cy = jnp.cos(py)                                 # (W, K_t)
    sy = jnp.sin(py)

    # H-tile phase tables: cos/sin(kx * x_i) for the rows of this tile.
    row0 = h * H_t - (H // 2)
    xi = (jax.lax.broadcasted_iota(jnp.int32, (H_t, K_t), 0) + row0).astype(jnp.float32)
    px = xi * kx
    cx = jnp.cos(px)                                 # (H_t, K_t)
    sx = jnp.sin(px)

    # Stage 1 (MXU): contract the image's W axis.  Rows = [re(c,h); im(c,h)].
    a = img_ref[0].reshape(2 * CH * H_t, W)          # tile-aligned collapse (H_t % 8 == 0)
    pc = jnp.dot(a, cy, preferred_element_type=jnp.float32).reshape(2, CH, H_t, K_t)
    ps = jnp.dot(a, sy, preferred_element_type=jnp.float32).reshape(2, CH, H_t, K_t)
    # partial transform along W:  img * (cy - i*sy)
    p_re = pc[0] + ps[1]                             # (CH, H_t, K_t)
    p_im = pc[1] - ps[0]

    # Stage 2 (VPU + sublane reduce): multiply by (cx - i*sx), reduce the H tile,
    # accumulate into the resident output block.
    cxb = cx[None]
    sxb = sx[None]
    out_ref[0, 0] += jnp.sum(cxb * p_re + sxb * p_im, axis=1)   # Re
    out_ref[0, 1] += jnp.sum(cxb * p_im - sxb * p_re, axis=1)   # Im

    del n_h  # (kept for clarity: output is written back automatically after last h)


def nufft_2d(image, kspace_traj, nufft_im_size):
    """Exact type-2 NUDFT.  image: (B,PH,CH,H,W) complex64, traj: (B,PH,2,K) f32."""
    H, W = nufft_im_size
    B, PH, CH, Hi, Wi = image.shape
    assert (Hi, Wi) == (H, W)
    K = kspace_traj.shape[-1]
    BP = B * PH

    H_t, K_t, vmem_limit = _pick_tiles(H, W, CH, K)
    K_pad = _round_up(K, K_t)
    n_k = K_pad // K_t
    n_h = H // H_t

    # Glue (plain JAX): single stacked real/imag image operand (no [im;-re] dup).
    img = image.reshape(BP, CH, H, W)
    img_a = jnp.stack([jnp.real(img), jnp.imag(img)], axis=1).astype(jnp.float32)  # (BP,2,CH,H,W)

    traj = kspace_traj.reshape(BP, 2, K).astype(jnp.float32)
    if K_pad != K:
        # Padded k columns get phase 0 (finite values) and are sliced off below.
        traj = jnp.pad(traj, ((0, 0), (0, 0), (0, K_pad - K)))

    kernel = functools.partial(_nufft_kernel, H=H, W=W, CH=CH)
    out = pl.pallas_call(
        kernel,
        out_shape=jax.ShapeDtypeStruct((BP, 2, CH, K_pad), jnp.float32),
        grid_spec=pltpu.PrefetchScalarGridSpec(
            num_scalar_prefetch=0,
            grid=(BP, n_k, n_h),                         # H reduction innermost
            in_specs=[
                pl.BlockSpec((1, 2, K_t), lambda bp, kt, ht: (bp, 0, kt)),            # traj
                pl.BlockSpec((1, 2, CH, H_t, W), lambda bp, kt, ht: (bp, 0, 0, ht, 0)),  # image
            ],
            out_specs=pl.BlockSpec((1, 2, CH, K_t), lambda bp, kt, ht: (bp, 0, 0, kt)),
        ),
        compiler_params=pltpu.CompilerParams(
            dimension_semantics=("parallel", "parallel", "arbitrary"),
            vmem_limit_bytes=vmem_limit,
        ),
    )(traj, img_a)

    out = out[..., :K]                                   # (BP, 2, CH, K)
    ksp = (out[:, 0] + 1j * out[:, 1]).astype(jnp.complex64)
    return ksp.reshape(B, PH, CH, K)


class NUFFT:
    """JAX/Pallas analogue of the PyTorch NUFFT module (forward path)."""

    def __init__(self, nufft_im_size):
        self.nufft_im_size = nufft_im_size
        self.kspace_traj = None

    def generate_forward_operator(self, kspace_traj):
        self.kspace_traj = kspace_traj

    def forward(self, image):
        return nufft_2d(image, self.kspace_traj, self.nufft_im_size)

    # TODO(synk): adjoint (nufft_adj_2d, type-1 NUDFT) not required for the forward path.
    __call__ = forward


def _nudft_ref(image, traj, im_size):
    """Pure-JAX reference (exact NUDFT) for validation."""
    H, W = im_size
    xs = jnp.arange(H, dtype=jnp.float32) - H // 2
    ys = jnp.arange(W, dtype=jnp.float32) - W // 2
    gx, gy = jnp.meshgrid(xs, ys, indexing="ij")
    coords = jnp.stack([gx.ravel(), gy.ravel()], axis=-1)          # (HW, 2)
    phase = jnp.einsum("nd,bpdk->bpnk", coords, traj)              # (B,PH,HW,K)
    kern = jnp.exp(-1j * phase.astype(jnp.complex64))
    img_flat = image.reshape(*image.shape[:-2], -1)                # (B,PH,CH,HW)
    return jnp.einsum("bpcn,bpnk->bpck", img_flat, kern)


if __name__ == "__main__":
    B, PH, CH, H, W, K = 2, 2, 4, 16, 16, 64
    key = jax.random.PRNGKey(0)
    k1, k2, k3 = jax.random.split(key, 3)

    image = (jax.random.normal(k1, (B, PH, CH, H, W), dtype=jnp.float32)
             + 1j * jax.random.normal(k2, (B, PH, CH, H, W), dtype=jnp.float32)
             ).astype(jnp.complex64)
    kspace_traj = jax.random.uniform(
        k3, (B, PH, 2, K), dtype=jnp.float32, minval=-jnp.pi, maxval=jnp.pi)

    model = NUFFT(nufft_im_size=(H, W))
    model.generate_forward_operator(kspace_traj)

    out = model(image)
    out = jax.block_until_ready(out)

    ref = _nudft_ref(image, kspace_traj, (H, W))
    assert out.shape == (B, PH, CH, K) and out.dtype == jnp.complex64
    err = float(jnp.max(jnp.abs(out - ref)) / (jnp.max(jnp.abs(ref)) + 1e-8))
    assert err < 1e-3, f"mismatch vs reference: rel err {err}"

    print("KERNEL_OK")
</pallas_src>

<mosaic_0001>
module attributes {stable_mosaic.version = 11 : i64} {
  func.func @_nufft_kernel(%arg0: i32, %arg1: i32, %arg2: i32, %arg3: memref<1x2x128xf32, #tpu.memory_space<vmem>>, %arg4: memref<1x2x4x16x16xf32, #tpu.memory_space<vmem>>, %arg5: memref<1x2x4x128xf32, #tpu.memory_space<vmem>>) attributes {dimension_semantics = [#tpu.dimension_semantics<parallel>, #tpu.dimension_semantics<parallel>, #tpu.dimension_semantics<arbitrary>], iteration_bounds = array<i64: 4, 1, 1>, scalar_prefetch = 0 : i64, scratch_operands = 0 : i64, tpu.core_type = #tpu.core_type<tc>, window_params = [{transform_indices = @transform_0, window_bounds = array<i64: 1, 2, 128>}, {transform_indices = @transform_1, window_bounds = array<i64: 1, 2, 4, 16, 16>}, {transform_indices = @transform_2, window_bounds = array<i64: 1, 2, 4, 128>}]} {
    %c0_i32 = arith.constant 0 : i32
    %0 = arith.cmpi eq, %arg2, %c0_i32 : i32
    %1 = arith.extui %0 : i1 to i32
    %c0_i32_0 = arith.constant 0 : i32
    %2 = arith.cmpi ne, %1, %c0_i32_0 : i32
    scf.if %2 {
      %cst_27 = arith.constant 0.000000e+00 : f32
      %68 = vector.broadcast %cst_27 : f32 to vector<1x2x4x128xf32>
      %c0_28 = arith.constant 0 : index
      %c0_29 = arith.constant 0 : index
      %c0_30 = arith.constant 0 : index
      %c0_31 = arith.constant 0 : index
      %69 = vector.load %arg5[%c0_28, %c0_29, %c0_30, %c0_31] : memref<1x2x4x128xf32, #tpu.memory_space<vmem>>, vector<1x2x4x128xf32>
      tpu.vector_store %arg5[%c0_28, %c0_29, %c0_30, %c0_31], %68 {strides = array<i32>} : memref<1x2x4x128xf32, #tpu.memory_space<vmem>>, vector<1x2x4x128xf32>,
    } else {
    }
    %c0 = arith.constant 0 : index
    %c0_1 = arith.constant 0 : index
    %c0_2 = arith.constant 0 : index
    %3 = vector.load %arg3[%c0, %c0_1, %c0_2] : memref<1x2x128xf32, #tpu.memory_space<vmem>>, vector<1x2x128xf32>
    %4 = vector.shape_cast %3 : vector<1x2x128xf32> to vector<2x128xf32>
    %5 = vector.extract_strided_slice %4 {offsets = [0, 0], sizes = [1, 128], strides = [1, 1]} : vector<2x128xf32> to vector<1x128xf32>
    %6 = vector.extract_strided_slice %4 {offsets = [1, 0], sizes = [1, 128], strides = [1, 1]} : vector<2x128xf32> to vector<1x128xf32>
    %7 = tpu.iota {dimensions = array<i32: 0>} : vector<16x128xi32>
    %c8_i32 = arith.constant 8 : i32
    %8 = vector.broadcast %c8_i32 : i32 to vector<16x128xi32>
    %9 = arith.subi %7, %8 : vector<16x128xi32>
    %10 = arith.sitofp %9 : vector<16x128xi32> to vector<16x128xf32>
    %11 = vector.broadcast %6 : vector<1x128xf32> to vector<16x128xf32>
    %12 = arith.mulf %10, %11 : vector<16x128xf32>
    %13 = math.cos %12 : vector<16x128xf32>
    %14 = math.sin %12 : vector<16x128xf32>
    %c16_i32 = arith.constant 16 : i32
    %15 = arith.muli %arg2, %c16_i32 : i32
    %c8_i32_3 = arith.constant 8 : i32
    %16 = arith.subi %15, %c8_i32_3 : i32
    %17 = tpu.iota {dimensions = array<i32: 0>} : vector<16x128xi32>
    %18 = vector.broadcast %16 : i32 to vector<16x128xi32>
    %19 = arith.addi %17, %18 : vector<16x128xi32>
    %20 = arith.sitofp %19 : vector<16x128xi32> to vector<16x128xf32>
    %21 = vector.broadcast %5 : vector<1x128xf32> to vector<16x128xf32>
    %22 = arith.mulf %20, %21 : vector<16x128xf32>
    %23 = math.cos %22 : vector<16x128xf32>
    %24 = math.sin %22 : vector<16x128xf32>
    %c0_4 = arith.constant 0 : index
    %c0_5 = arith.constant 0 : index
    %c0_6 = arith.constant 0 : index
    %c0_7 = arith.constant 0 : index
    %c0_8 = arith.constant 0 : index
    %25 = vector.load %arg4[%c0_4, %c0_5, %c0_6, %c0_7, %c0_8] : memref<1x2x4x16x16xf32, #tpu.memory_space<vmem>>, vector<1x2x4x16x16xf32>
    %26 = vector.shape_cast %25 : vector<1x2x4x16x16xf32> to vector<2x4x16x16xf32>
    %27 = vector.shape_cast %26 : vector<2x4x16x16xf32> to vector<128x16xf32>
    %cst = arith.constant dense<0.000000e+00> : vector<128x128xf32>
    %28 = tpu.matmul %27, %13, %cst {dimension_numbers = #tpu.dot_dimension_numbers<[1], [0], [0], [1], [0, 0, 1, 1], [], []>} : vector<128x16xf32>, vector<16x128xf32>, vector<128x128xf32> -> vector<128x128xf32>
    %29 = vector.shape_cast %28 : vector<128x128xf32> to vector<2x4x16x128xf32>
    %cst_9 = arith.constant dense<0.000000e+00> : vector<128x128xf32>
    %30 = tpu.matmul %27, %14, %cst_9 {dimension_numbers = #tpu.dot_dimension_numbers<[1], [0], [0], [1], [0, 0, 1, 1], [], []>} : vector<128x16xf32>, vector<16x128xf32>, vector<128x128xf32> -> vector<128x128xf32>
    %31 = vector.shape_cast %30 : vector<128x128xf32> to vector<2x4x16x128xf32>
    %32 = vector.extract_strided_slice %29 {offsets = [0, 0, 0, 0], sizes = [1, 4, 16, 128], strides = [1, 1, 1, 1]} : vector<2x4x16x128xf32> to vector<1x4x16x128xf32>
    %33 = vector.shape_cast %32 : vector<1x4x16x128xf32> to vector<4x16x128xf32>
    %34 = vector.extract_strided_slice %31 {offsets = [1, 0, 0, 0], sizes = [1, 4, 16, 128], strides = [1, 1, 1, 1]} : vector<2x4x16x128xf32> to vector<1x4x16x128xf32>
    %35 = vector.shape_cast %34 : vector<1x4x16x128xf32> to vector<4x16x128xf32>
    %36 = arith.addf %33, %35 : vector<4x16x128xf32>
    %37 = vector.extract_strided_slice %29 {offsets = [1, 0, 0, 0], sizes = [1, 4, 16, 128], strides = [1, 1, 1, 1]} : vector<2x4x16x128xf32> to vector<1x4x16x128xf32>
    %38 = vector.shape_cast %37 : vector<1x4x16x128xf32> to vector<4x16x128xf32>
    %39 = vector.extract_strided_slice %31 {offsets = [0, 0, 0, 0], sizes = [1, 4, 16, 128], strides = [1, 1, 1, 1]} : vector<2x4x16x128xf32> to vector<1x4x16x128xf32>
    %40 = vector.shape_cast %39 : vector<1x4x16x128xf32> to vector<4x16x128xf32>
    %41 = arith.subf %38, %40 : vector<4x16x128xf32>
    %42 = vector.shape_cast %23 : vector<16x128xf32> to vector<1x16x128xf32>
    %43 = vector.shape_cast %24 : vector<16x128xf32> to vector<1x16x128xf32>
    %c0_10 = arith.constant 0 : index
    %c0_11 = arith.constant 0 : index
    %c0_12 = arith.constant 0 : index
    %c0_13 = arith.constant 0 : index
    %44 = vector.load %arg5[%c0_10, %c0_11, %c0_12, %c0_13] : memref<1x2x4x128xf32, #tpu.memory_space<vmem>>, vector<1x1x4x128xf32>
    %45 = vector.shape_cast %44 : vector<1x1x4x128xf32> to vector<4x128xf32>
    %46 = vector.broadcast %42 : vector<1x16x128xf32> to vector<4x16x128xf32>
    %47 = arith.mulf %46, %36 : vector<4x16x128xf32>
    %48 = vector.broadcast %43 : vector<1x16x128xf32> to vector<4x16x128xf32>
    %49 = arith.mulf %48, %41 : vector<4x16x128xf32>
    %50 = arith.addf %47, %49 : vector<4x16x128xf32>
    %cst_14 = arith.constant dense<0.000000e+00> : vector<4x128xf32>
    %51 = vector.multi_reduction <add>, %50, %cst_14 [1] : vector<4x16x128xf32> to vector<4x128xf32>
    %52 = arith.addf %45, %51 : vector<4x128xf32>
    %c0_15 = arith.constant 0 : index
    %c0_16 = arith.constant 0 : index
    %c0_17 = arith.constant 0 : index
    %c0_18 = arith.constant 0 : index
    %53 = vector.load %arg5[%c0_15, %c0_16, %c0_17, %c0_18] : memref<1x2x4x128xf32, #tpu.memory_space<vmem>>, vector<1x1x4x128xf32>
    %54 = vector.shape_cast %53 : vector<1x1x4x128xf32> to vector<4x128xf32>
    %55 = vector.shape_cast %52 : vector<4x128xf32> to vector<1x1x4x128xf32>
    tpu.vector_store %arg5[%c0_15, %c0_16, %c0_17, %c0_18], %55 {strides = array<i32>} : memref<1x2x4x128xf32, #tpu.memory_space<vmem>>, vector<1x1x4x128xf32>,
    %c0_19 = arith.constant 0 : index
    %c1 = arith.constant 1 : index
    %c0_20 = arith.constant 0 : index
    %c0_21 = arith.constant 0 : index
    %56 = vector.load %arg5[%c0_19, %c1, %c0_20, %c0_21] : memref<1x2x4x128xf32, #tpu.memory_space<vmem>>, vector<1x1x4x128xf32>
    %57 = vector.shape_cast %56 : vector<1x1x4x128xf32> to vector<4x128xf32>
    %58 = vector.broadcast %42 : vector<1x16x128xf32> to vector<4x16x128xf32>
    %59 = arith.mulf %58, %41 : vector<4x16x128xf32>
    %60 = vector.broadcast %43 : vector<1x16x128xf32> to vector<4x16x128xf32>
    %61 = arith.mulf %60, %36 : vector<4x16x128xf32>
    %62 = arith.subf %59, %61 : vector<4x16x128xf32>
    %cst_22 = arith.constant dense<0.000000e+00> : vector<4x128xf32>
    %63 = vector.multi_reduction <add>, %62, %cst_22 [1] : vector<4x16x128xf32> to vector<4x128xf32>
    %64 = arith.addf %57, %63 : vector<4x128xf32>
    %c0_23 = arith.constant 0 : index
    %c1_24 = arith.constant 1 : index
    %c0_25 = arith.constant 0 : index
    %c0_26 = arith.constant 0 : index
    %65 = vector.load %arg5[%c0_23, %c1_24, %c0_25, %c0_26] : memref<1x2x4x128xf32, #tpu.memory_space<vmem>>, vector<1x1x4x128xf32>
    %66 = vector.shape_cast %65 : vector<1x1x4x128xf32> to vector<4x128xf32>
    %67 = vector.shape_cast %64 : vector<4x128xf32> to vector<1x1x4x128xf32>
    tpu.vector_store %arg5[%c0_23, %c1_24, %c0_25, %c0_26], %67 {strides = array<i32>} : memref<1x2x4x128xf32, #tpu.memory_space<vmem>>, vector<1x1x4x128xf32>,
    return
  }
  func.func @transform_0(%arg0: i32, %arg1: i32, %arg2: i32) -> (i32, i32, i32) {
    %c0_i32 = arith.constant 0 : i32
    %c0_i32_0 = arith.constant 0 : i32
    return %arg0, %c0_i32, %arg1 : i32, i32, i32
  }
  func.func @transform_1(%arg0: i32, %arg1: i32, %arg2: i32) -> (i32, i32, i32, i32, i32) {
    %c0_i32 = arith.constant 0 : i32
    %c0_i32_0 = arith.constant 0 : i32
    %c0_i32_1 = arith.constant 0 : i32
    %c0_i32_2 = arith.constant 0 : i32
    return %arg0, %c0_i32, %c0_i32_0, %arg2, %c0_i32_1 : i32, i32, i32, i32, i32
  }
  func.func @transform_2(%arg0: i32, %arg1: i32, %arg2: i32) -> (i32, i32, i32, i32) {
    %c0_i32 = arith.constant 0 : i32
    %c0_i32_0 = arith.constant 0 : i32
    %c0_i32_1 = arith.constant 0 : i32
    return %arg0, %c0_i32, %c0_i32_0, %arg1 : i32, i32, i32, i32
  }
}

</mosaic_0001>

<bundles_post_ra>
// kernel: tpu_custom_call.1
= control target key start
LH: loop header
LB: loop body
LE: loop exit
PB: predicated region body
PF: predicated region fallthrough
CT: control target
= control target key end

     0   :  { %7 = vsyncpa [#allocation3], 0  ;;  %s2737_s0 = inlined_call_operand.hbm [shape: f32[4,2,128], index: 0, kind: input, shape index: {}]   ;;  %s2738_s1 = inlined_call_operand.hbm [shape: f32[4,2,4,16,16], index: 1, kind: input, shape index: {}]   ;;  %s2739_s2 = inlined_call_operand.hbm [shape: f32[4,2,4,128], index: 2, kind: output, shape index: {}]  }
   0x1   :  { %9 = vsyncpa [#allocation3 + $0x1], 0 }
   0x2   :  { %10 = vsyncpa [#allocation6], 0 }
   0x3   :  { %12 = vsyncpa [#allocation6 + $0x1], 0 }
   0x4   :  { %13 = vsyncpa [#allocation4], 0 }
   0x5   :  { %15 = vsyncpa [#allocation4 + $0x1], 0  ;;  %s2177_s9 = smov 0   ;;  %s2179_s10 = smov 0  }
   0x6   :  { %s2181_s11 = smov 0   ;;  %s2183_s12 = smov 0  }
   0x7   :  { %s2185_s13 = smov 0   ;;  %s2187_s14 = smov 0  }
   0x8 LB: > { %s1717_s15 = sadd.s32 4294967295, %s2146_s14   ;;  %s1718_s16 = sadd.s32 4294967294, %s2146_s14   ;;  %s2146_s14 = sphi %s2187_s14, %s21_s14   ;;  %s2142_s13 = sphi %s2185_s13, %s2752_s13   ;;  %s2138_s12 = sphi %s2183_s12, %s2751_s12   ;;  %s2134_s11 = sphi %s2181_s11, %s2750_s11   ;;  %s2130_s10 = sphi %s2179_s10, %s2749_s10   ;;  %s2126_s9 = sphi %s2177_s9, %s2748_s9  }
   0x9   : > { %s40_s17 = sadd.s32 1, %s2142_s13  ;;  %s49_s18 = sadd.s32 1, %s2134_s11 }
   0xa   : > { %p42_p0 = scmp.ge.s32.totalorder %s40_s17, 4  ;;  %p56_p1 = scmp.ne.s32.totalorder %s2134_s11, %s2130_s10 }
   0xb   : > { %p57_p2 = scmp.eq.s32.totalorder %s2146_s14, 0  ;;  %p62_p3 = scmp.ne.s32.totalorder %s2130_s10, %s2126_s9 }
   0xc   : > { %s2754_s17 = smov (%p42_p0, %s40_s17), 0  ;;  %p63_p5 = scmp.eq.s32.totalorder %s1717_s15, 0 }
   0xd   : > { %p2218_p4 = por %p57_p2, %p56_p1  ;;  %s44_s20 = ssub.s32 %s2142_s13, %s2754_s17 }
   0xe   : > { %p116_p6 = scmp.eq.s32.totalorder %s1717_s15, 3  ;;  %p47_p7 = scmp.eq.s32.totalorder %s44_s20, 0 }
   0xf   : > { %p2224_p8 = por %p63_p5, %p62_p3  ;;  %p122_p10 = scmp.eq.s32.totalorder %s1718_s16, 3 }
  0x10   : > { %p2228_p9 = por %p116_p6, %p56_p1  ;;  %p1929_p12 = scmp.lt.s32.totalorder %s2146_s14, 4 }
  0x11   : > { %s2233_s23 = scalar_select %p47_p7, %s2134_s11, %s49_s18  }
  0x12   : > { %p2235_p11 = por %p122_p10, %p62_p3  ;;  %s2241_s25 = sand.u32 1, %s2134_s11  }
  0x13   : > { %s1721_s26 = sshll.u32 %s2241_s25, 1  ;;  %s1722_s27 = sshll.u32 %s2142_s13, 5 }
  0x14   : > { %s152_s30 = scalar_lea.hbm %s2737_s0, %s1722_s27  ;;  %s146_s3 = scalar_lea.vmem [#allocation2], %s1721_s26 }
  0x15   : > { %s154_s4 = sshll.u32 %s146_s3, 4  ;;  %p2250_p13 = pnand %p1929_p12, %p2218_p4  ;;  %s155_s4 = int_to_ptr.vmem [resolvable:$true] %s154_s4 }
  0x16   : > { %p1726_p0 = scmp.ge.s32.totalorder %s2146_s14, 1  ;;  %p182_p1 = scmp.lt.s32.totalorder %s2146_s14, 5 }
  0x17   : > { %s143_s6 = scalar_lea.sflag [#allocation3], %s2241_s25  ;;  %p2008_p2 = pneg %p2250_p13 }
  0x18   : > { %s2019_s7 = scalar_lea.vmem %s155_s4, 32  ;;  %s2148_s8 = smov [#allocation2]  }
  0x19   : > { %p2020_p3 = scmp.ne.s32.totalorder %s155_s4, %s2019_s7  ;;  %s2024_s15 = sshll.u32 %s2148_s8, 4  ;;  %s2025_s15 = int_to_ptr.vmem [resolvable:$false] %s2024_s15 }
  0x1a   : > { %s2026_s16 = scalar_lea.vmem %s2025_s15, 64  ;;  %p2027_p4 = scmp.lt.s32.totalorder %s155_s4, %s2025_s15 }
  0x1b   : > { %p2022_p5 = pnand %p2020_p3, %p2008_p2  ;;  %p2028_p7 = scmp.lt.s32.totalorder %s2026_s16, %s2019_s7 }
  0x1d   : > { %p2023_p6 = pneg %p2022_p5  ;;  %p2029_p10 = por %p2028_p7, %p2027_p4 }
  0x1f   : > { %p2030_p12 = pnand %p2029_p10, %p2023_p6 }
  0x21   : > { %2033 = shalt.err (!%p2030_p12)
}
  0x22   : > { %1921 = dma.hbm_to_vmem [thread:$0]  (!%p2250_p13), %s152_s30, 32, %s155_s4, %s143_s6  }
  0x23   : > { %p2268_p3 = pnand %p1726_p0, %p182_p1  ;;  %s1723_s19 = sshll.u32 %s2241_s25, 7 }
  0x24   : > { %s1802_s20 = sshll.u32 %s2142_s13, 11  ;;  %s165_s29 = scalar_lea.vmem [#allocation5], %s1723_s19 }
  0x25   : > { %s173_s28 = scalar_lea.hbm %s2738_s1, %s1802_s20  ;;  %s174_s3 = sshll.u32 %s165_s29, 4  ;;  %s175_s3 = int_to_ptr.vmem [resolvable:$true] %s174_s3 }
  0x26   : > { %s162_s7 = scalar_lea.sflag [#allocation6], %s2241_s25  ;;  %s2047_s8 = scalar_lea.vmem %s175_s3, 2048 }
  0x27   : > { %p2048_p5 = scmp.ne.s32.totalorder %s175_s3, %s2047_s8  ;;  %s2149_s30 = smov [#allocation5]  }
  0x28   : > { %s2052_s4 = sshll.u32 %s2149_s30, 4  ;;  %s2053_s4 = int_to_ptr.vmem [resolvable:$false] %s2052_s4 }
  0x29   : > { %p2050_p6 = pnand %p2048_p5, %p2008_p2  ;;  %s2054_s6 = scalar_lea.vmem %s2053_s4, 4096 }
  0x2a   : > { %p2055_p0 = scmp.lt.s32.totalorder %s175_s3, %s2053_s4  ;;  %p2056_p1 = scmp.lt.s32.totalorder %s2054_s6, %s2047_s8 }
  0x2b   : > { %p2051_p4 = pneg %p2050_p6 }
  0x2c   : > { %p2057_p7 = por %p2056_p1, %p2055_p0 }
  0x2e   : > { %p2058_p10 = pnand %p2057_p7, %p2051_p4 }
  0x30   : > { %2061 = shalt.err (!%p2058_p10)
}
  0x31   : > { %s2150_s15 = smov 128   ;;  %s2151_s16 = smov 8  }
  0x32   : > { %1924 = dma.hbm_to_vmem [thread:$0]  (!%p2250_p13), %s173_s28, 2048, %s175_s3, %s162_s7, %s2150_s15, %s2150_s15, %s2151_s16  }
  0x33   : > { %186 = sbr.rel (%p2268_p3) target bundleno = 429 (0x1ad), region = 28  ;;  %s2286_s25 = sand.u32 (!%p2268_p3), 1, %s2130_s10  }
  0x34   : > { %s1727_s19 = sshll.u32 (!%p2268_p3), %s2286_s25, 1  ;;  %s189_s20 = scalar_lea.sflag (!%p2268_p3), [#allocation3], %s2286_s25 }
  0x35   : > { %s192_s26 = scalar_lea.vmem (!%p2268_p3), [#allocation2], %s1727_s19 }
  0x38   : > { %2113 = dma.done.wait (%p2224_p8), %s189_s20, 32  }
  0x39   : > { %2115 = vsyncadd (%p2224_p8), %s189_s20, 4294967264  ;;  %s1728_s5 = sshll.u32 %s2286_s25, 7  ;;  %s198_s18 = scalar_lea.sflag [#allocation6], %s2286_s25 }
  0x3a   : > { %s2296_s27 = scalar_lea.vmem [#allocation5], %s1728_s5 }
  0x3b   : > { %2117 = dma.done.wait (%p2224_p8), %s198_s18, 2048  }
  0x3c   : > { %2119 = vsyncadd (%p2224_p8), %s198_s18, 4294965248  ;;  %v235_v0 = vlaneseq  ;;  %vm1104_vm0 = vcmask 130048   ;;  %v234_v8 = vld [vmem:[%s192_s26] sm:$0x3]  ;;  %v1088_v9 = vld [vmem:[%s2296_s27] sm:$0xff]  ;;  %s1729_s21 = sshll.u32 %s2286_s25, 3 }
  0x3d   : > { %1844 = vmatprep.mubr.msk.f32.mxu0 %vm1104_vm0, %v1088_v9  ;;  %1872 = vmatprep.mubr.msk.f32.mxu1 %vm1104_vm0, %v1088_v9  ;;  %v2152_v31 = vmov 683565275   ;;  %v2153_v33 = vmov 2475754826   ;;  %v2154_v35 = vmov 2131351028  }
  0x3e   : > { %v236_v1 = vshrl.u32 %v235_v0, 7  ;;  %v2155_v37 = vmov 2102212464   ;;  %v2156_v39 = vmov 920167782   ;;  %s2571_s28 = scalar_lea.vmem [#allocation7], %s1729_s21 }
  0x3f   : > { %v2157_v48 = vmov 1326507024   ;;  %s1803_s29 = sshll.u32 %s2138_s12, 7  ;;  %s1604_s3 = sshll.u32 %s2571_s28, 4  ;;  %s2688_s3 = int_to_ptr.vmem [resolvable:$true] %s1604_s3 }
  0x40   : > { %v237_v2 = vadd.s32 8, %v236_v1  ;;  %v1730_v3 = vadd.s32 4294967288, %v236_v1  ;;  %v243_v4 = vsub.s32 1, %v236_v1  ;;  %v670_v5 = vsub.s32 0, %v236_v1  ;;  %s2686_s12 = scalar_lea.hbm %s2739_s2, %s1803_s29  ;;  %s1590_s30 = scalar_lea.sflag [#allocation4], %s2286_s25 }
  0x41   : > { %v240_v6 = vcvt.s32.f32 %v236_v1  ;;  %s2062_s4 = scalar_lea.vmem %s2688_s3, 128  ;;  %s2159_s6 = smov [#allocation7]  }
  0x42   : > { %v665_v7 = vadd.s32 4294967288, %v237_v2  ;;  %v239_v10 = vcvt.s32.f32 %v1730_v3  ;;  %v244_v11 = vrot.slane %v234_v8, %v243_v4  ;;  %v671_v13 = vrot.slane %v234_v8, %v670_v5  ;;  %p2063_p8 = scmp.ne.s32.totalorder %s2688_s3, %s2062_s4  ;;  %s2066_s15 = sshll.u32 %s2159_s6, 4  ;;  %s2067_s15 = int_to_ptr.vmem [resolvable:$false] %s2066_s15 }
  0x43   : > { %s2068_s16 = scalar_lea.vmem %s2067_s15, 256  ;;  %p2069_p12 = scmp.lt.s32.totalorder %s2688_s3, %s2067_s15 }
  0x44   : > { %v667_v12 = vcvt.s32.f32 %v665_v7  ;;  %v2305_v14 = vmul.f32 %v244_v11, %v240_v6  ;;  %v2307_v15 = vmul.f32 %v671_v13, %v239_v10  ;;  %v2313_v20 = vmul.f32 %v244_v11, %v239_v10  ;;  %p2064_p13 = pnand %p2063_p8, %p2228_p9  ;;  %p2070_p3 = scmp.lt.s32.totalorder %s2068_s16, %s2062_s4 }
  0x46   : > { %v2309_v16 = vmul.f32 %v671_v13, %v667_v12  ;;  %v353_v17 = vand.u32 2139095040, %v2305_v14  ;;  %v350_v18 = vand.u32 2147483647, %v2305_v14  ;;  %v250_v24 = vand.u32 2139095040, %v2313_v20  ;;  %p2065_p2 = pneg %p2064_p13  ;;  %p2071_p5 = por %p2070_p3, %p2069_p12 }
  0x47   : > { %v247_v42 = vand.u32 2147483647, %v2313_v20  ;;  %vm352_vm14 = vcmp.lt.s32.totalorder %v2305_v14, 0 }
  0x48   : > { %v354_v19 = vshrl.u32 %v353_v17, 23  ;;  %v357_v22 = vand.u32 8388607, %v350_v18  ;;  %v251_v29 = vshrl.u32 %v250_v24, 23  ;;  %vm351_vm15 = vcmp.le.f32.partialorder %v350_v18, 0.7853982  ;;  %p2072_p6 = pnand %p2071_p5, %p2065_p2 }
  0x49   : > { %v254_v9 = vand.u32 8388607, %v247_v42 }
  0x4a   : > { %v1735_v21 = vadd.s32 4294967169, %v354_v19  ;;  %v358_v25 = vor.u32 8388608, %v357_v22  ;;  %v1731_v50 = vadd.s32 4294967169, %v251_v29 }
  0x4b   : > { %v255_v19 = vor.u32 8388608, %v254_v9 }
  0x4c   : > { %v360_v23 = vadd.s32 1, %v1735_v21  ;;  %v398_v41 = vshll.u32 %v358_v25, 8  ;;  %v257_v63 = vadd.s32 1, %v1731_v50 }
  0x4d   : > { %v295_v50 = vshll.u32 %v255_v19, 8 }
  0x4e   : > { %vm361_vm1 = vcmp.gt.s32.totalorder %v360_v23, 0  ;;  %vm258_vm6 = vcmp.gt.s32.totalorder %v257_v63, 0 }
  0x4f   : > { %v362_v26 = vsel %vm361_vm1, %v360_v23, 0  ;;  %v259_v10 = vsel %vm258_vm6, %v257_v63, 0 }
  0x50   : > { %v364_v27 = vand.u32 31, %v362_v26  ;;  %v363_v28 = vshrl.u32 %v362_v26, 5  ;;  %v260_v12 = vshrl.u32 %v259_v10, 5  ;;  %v261_v13 = vand.u32 31, %v259_v10 }
  0x52   : > { %v365_v30 = vsub.s32 32, %v364_v27  ;;  %v367_v32 = vshll.u32 %v2152_v31, %v364_v27  ;;  %v370_v34 = vshll.u32 %v2153_v33, %v364_v27  ;;  %v373_v36 = vshll.u32 %v2154_v35, %v364_v27 }
  0x53   : > { %v376_v38 = vshll.u32 %v2155_v37, %v364_v27  ;;  %v379_v40 = vshll.u32 %v2156_v39, %v364_v27  ;;  %vm382_vm2 = vcmp.lt.s32.totalorder %v363_v28, 1  ;;  %vm385_vm3 = vcmp.lt.s32.totalorder %v363_v28, 4 }
  0x54   : > { %v366_v43 = vshrl.u32 %v2152_v31, %v365_v30  ;;  %v368_v44 = vshrl.u32 %v2153_v33, %v365_v30  ;;  %v371_v45 = vshrl.u32 %v2154_v35, %v365_v30  ;;  %v374_v46 = vshrl.u32 %v2155_v37, %v365_v30 }
  0x55   : > { %v377_v47 = vshrl.u32 %v2156_v39, %v365_v30  ;;  %v380_v49 = vshrl.u32 %v2157_v48, %v365_v30  ;;  %vm383_vm4 = vcmp.lt.s32.totalorder %v363_v28, 2  ;;  %vm384_vm5 = vcmp.lt.s32.totalorder %v363_v28, 3 }
  0x56   : > { %v369_v51 = vor.u32 %v368_v44, %v367_v32  ;;  %v372_v52 = vor.u32 %v371_v45, %v370_v34  ;;  %v375_v53 = vor.u32 %v374_v46, %v373_v36  ;;  %v262_v21 = vsub.s32 32, %v261_v13 }
  0x57   : > { %v378_v54 = vor.u32 %v377_v47, %v376_v38  ;;  %v381_v55 = vor.u32 %v380_v49, %v379_v40  ;;  %v264_v22 = vshll.u32 %v2152_v31, %v261_v13  ;;  %v267_v23 = vshll.u32 %v2153_v33, %v261_v13 }
  0x58   : > { %v386_v56 = vsel %vm382_vm2, %v366_v43, %v369_v51  ;;  %v387_v57 = vsel %vm385_vm3, %v375_v53, 2102212464  ;;  %v390_v58 = vsel %vm382_vm2, %v369_v51, %v372_v52  ;;  %v394_v59 = vsel %vm382_vm2, %v372_v52, %v375_v53 }
  0x59   : > { %v388_v60 = vsel %vm384_vm5, %v372_v52, %v387_v57  ;;  %v391_v61 = vsel %vm385_vm3, %v378_v54, 920167782  ;;  %v395_v62 = vsel %vm385_vm3, %v381_v55, 1326507024  ;;  %v270_v25 = vshll.u32 %v2154_v35, %v261_v13 }
  0x5a   : > { %v392_v0 = vsel %vm384_vm5, %v375_v53, %v391_v61  ;;  %v396_v1 = vsel %vm384_vm5, %v378_v54, %v395_v62  ;;  %v389_v2 = vsel %vm383_vm4, %v386_v56, %v388_v60  ;;  %v273_v26 = vshll.u32 %v2155_v37, %v261_v13 }
  0x5b   : > { %v393_v3 = vsel %vm383_vm4, %v390_v58, %v392_v0  ;;  %v397_v4 = vsel %vm383_vm4, %v394_v59, %v396_v1  ;;  %v405_v11 = vmul.u32 %v398_v41, %v389_v2  ;;  %v276_v27 = vshll.u32 %v2156_v39, %v261_v13 }
  0x5c   : > { %v2330_v5 = vmul.u32.u64.low %v398_v41, %v397_v4  ;;  %v2331_v6 = vmul.u32.u64.high %v398_v41, %v397_v4, %v2330_v5  ;;  %v2333_v7 = vmul.u32.u64.low %v398_v41, %v393_v3  ;;  %v2334_v8 = vmul.u32.u64.high %v398_v41, %v393_v3, %v2333_v7 }
  0x5d   : > { %v265_v29 = vshrl.u32 %v2153_v33, %v262_v21  ;;  %v268_v30 = vshrl.u32 %v2154_v35, %v262_v21  ;;  %vm279_vm8 = vcmp.lt.s32.totalorder %v260_v12, 1  ;;  %v263_v32 = vshrl.u32 %v2152_v31, %v262_v21 }
  0x5e   : > { %vm407_vm7 = vc.u32 %v2331_v6, %v2333_v7  ;;  %v408_v17 = vadd.s32 1, %v2334_v8  ;;  %v271_v34 = vshrl.u32 %v2155_v37, %v262_v21  ;;  %v274_v36 = vshrl.u32 %v2156_v39, %v262_v21 }
  0x5f   : > { %v277_v38 = vshrl.u32 %v2157_v48, %v262_v21  ;;  %v266_v41 = vor.u32 %v265_v29, %v264_v22  ;;  %v269_v43 = vor.u32 %v268_v30, %v267_v23  ;;  %vm281_vm9 = vcmp.lt.s32.totalorder %v260_v12, 3 }
  0x60   : > { %v409_v24 = vsel %vm407_vm7, %v408_v17, %v2334_v8  ;;  %v272_v44 = vor.u32 %v271_v34, %v270_v25  ;;  %v275_v45 = vor.u32 %v274_v36, %v273_v26  ;;  %vm282_vm10 = vcmp.lt.s32.totalorder %v260_v12, 4 }
  0x61   : > { %v410_v28 = vadd.s32 %v409_v24, %v405_v11  ;;  %v278_v46 = vor.u32 %v277_v38, %v276_v27  ;;  %vm280_vm11 = vcmp.lt.s32.totalorder %v260_v12, 2  ;;  %v287_v49 = vsel %vm279_vm8, %v266_v41, %v269_v43 }
  0x62   : > { %v284_v51 = vsel %vm282_vm10, %v272_v44, 2102212464  ;;  %v288_v52 = vsel %vm282_vm10, %v275_v45, 920167782  ;;  %v291_v53 = vsel %vm279_vm8, %v269_v43, %v272_v44  ;;  %v283_v57 = vsel %vm279_vm8, %v263_v32, %v266_v41 }
  0x63   : > { %v411_v40 = vadd.s32 536870912, %v410_v28  ;;  %v292_v54 = vsel %vm282_vm10, %v278_v46, 1326507024  ;;  %v289_v56 = vsel %vm281_vm9, %v272_v44, %v288_v52  ;;  %v285_v60 = vsel %vm281_vm9, %v269_v43, %v284_v51 }
  0x64   : > { %v293_v58 = vsel %vm281_vm9, %v275_v45, %v292_v54  ;;  %v290_v61 = vsel %vm280_vm11, %v287_v49, %v289_v56  ;;  %v286_v2 = vsel %vm280_vm11, %v283_v57, %v285_v60  ;;  %v406_v17 = vadd.s32 %v2333_v7, %v2331_v6 }
  0x65   : > { %v412_v47 = vshrl.u32 %v411_v40, 30  ;;  %v294_v62 = vsel %vm280_vm11, %v291_v53, %v293_v58  ;;  %v2366_v3 = vmul.u32.u64.low %v295_v50, %v290_v61  ;;  %v2367_v4 = vmul.u32.u64.high %v295_v50, %v290_v61, %v2366_v3 }
  0x66   : > { %v2362_v63 = vmul.u32.u64.low %v295_v50, %v294_v62  ;;  %v2363_v0 = vmul.u32.u64.high %v295_v50, %v294_v62, %v2362_v63  ;;  %v302_v9 = vmul.u32 %v295_v50, %v286_v2  ;;  %vm249_vm2 = vcmp.lt.s32.totalorder %v2313_v20, 0 }
  0x67   : > { %v413_v55 = vshll.u32 %v412_v47, 30  ;;  %v305_v10 = vadd.s32 1, %v2367_v4  ;;  %v436_v7 = vsub.s32 4, %v412_v47  ;;  %vm2382_vm5 = vcmp.le.f32.partialorder %v247_v42, 0.7853982 }
  0x68   : > { %vm304_vm12 = vc.u32 %v2363_v0, %v2366_v3  ;;  %v303_v51 = vadd.s32 %v2366_v3, %v2363_v0  ;;  %vm442_vm10 = vweird.f32 %v2305_v14 }
  0x69   : > { %v414_v59 = vsub.s32 %v410_v28, %v413_v55  ;;  %v306_v13 = vsel %vm304_vm12, %v305_v10, %v2367_v4  ;;  %v437_v49 = vsel %vm352_vm14, %v436_v7, %v412_v47 }
  0x6a   : > { %v307_v19 = vadd.s32 %v306_v13, %v302_v9  ;;  %v439_v53 = vsel %vm351_vm15, 0, %v437_v49  ;;  %v1092_v49 = vld [vmem:[%s2296_s27 + $0x20] sm:$0xff] }
  0x6b   : > { %v416_v1 = vsub.s32 0, %v414_v59  ;;  %v650_v18 = vadd.s32 3, %v439_v53  ;;  %v443_v47 = vand.u32 3, %v439_v53  ;;  %v1096_v53 = vld [vmem:[%s2296_s27 + $0x40] sm:$0xff] }
  0x6c   : > { %v308_v24 = vadd.s32 536870912, %v307_v19 }
  0x6d   : > { %v1736_v5 = vmin.u32 %v416_v1, %v414_v59  ;;  %v651_v63 = vand.u32 3, %v650_v18  ;;  %vm448_vm3 = vcmp.eq.s32.totalorder %v443_v47, 2  ;;  %vm445_vm6 = vcmp.eq.s32.totalorder %v443_v47, 0  ;;  %v1102_v18 = vld [vmem:[%s2296_s27 + $0x70] sm:$0xff] }
  0x6e   : > { %v309_v27 = vshrl.u32 %v308_v24, 30  ;;  %vm444_vm8 = vcmp.lt.s32.totalorder %v443_v47, 2 }
  0x6f   : > { %v418_v8 = vclz %v1736_v5  ;;  %vm656_vm4 = vcmp.eq.s32.totalorder %v651_v63, 2  ;;  %vm653_vm7 = vcmp.eq.s32.totalorder %v651_v63, 0  ;;  %vm652_vm9 = vcmp.lt.s32.totalorder %v651_v63, 2 }
  0x70   : > { %v310_v30 = vshll.u32 %v309_v27, 30  ;;  %v333_v4 = vsub.s32 4, %v309_v27 }
  0x71   : > { %v1737_v11 = vadd.s32 4294967294, %v418_v8 }
  0x72   : > { %v311_v36 = vsub.s32 %v307_v19, %v310_v30 }
  0x73   : > { %vm1738_vm13 = vcmp.lt.s32.totalorder %v1737_v11, 0 }
  0x74   : > { %v421_v12 = vsel %vm1738_vm13, 0, %v1737_v11  ;;  %v313_v40 = vsub.s32 0, %v311_v36 }
  0x75   : > { %v422_v21 = vsub.s32 32, %v421_v12  ;;  %v423_v22 = vshll.u32 %v414_v59, %v421_v12  ;;  %v426_v23 = vsub.s32 4294967266, %v421_v12  ;;  %v334_v12 = vsel %vm249_vm2, %v333_v4, %v309_v27 }
  0x76   : > { %v1732_v6 = vmin.u32 %v313_v40, %v311_v36 }
  0x77   : > { %v424_v25 = vshrl.u32 %v406_v17, %v422_v21  ;;  %v427_v26 = vadd.s32 127, %v426_v23 }
  0x78   : > { %v315_v44 = vclz %v1732_v6 }
  0x79   : > { %v425_v28 = vor.u32 %v424_v25, %v423_v22  ;;  %v428_v29 = vshll.u32 %v427_v26, 23 }
  0x7a   : > { %v1733_v46 = vadd.s32 4294967294, %v315_v44 }
  0x7b   : > { %v429_v32 = vor.u32 4788187, %v428_v29  ;;  %v432_v34 = vcvt.s32.f32 %v425_v28 }
  0x7c   : > { %vm1734_vm1 = vcmp.lt.s32.totalorder %v1733_v46, 0 }
  0x7d   : > { %v430_v38 = vand.u32 2147483647, %v429_v32  ;;  %v318_v52 = vsel %vm1734_vm1, 0, %v1733_v46  ;;  %v1090_v46 = vld [vmem:[%s2296_s27 + $0x10] sm:$0xff] }
  0x7e   : > { %v319_v54 = vsub.s32 32, %v318_v52  ;;  %v320_v55 = vshll.u32 %v311_v36, %v318_v52  ;;  %v323_v56 = vsub.s32 4294967266, %v318_v52  ;;  %v1095_v52 = vld [vmem:[%s2296_s27 + $0x38] sm:$0xff] }
  0x7f   : > { %v433_v41 = vmul.f32 %v432_v34, %v430_v38 }
  0x80   : > { %v321_v57 = vshrl.u32 %v303_v51, %v319_v54  ;;  %v324_v58 = vadd.s32 127, %v323_v56  ;;  %v1094_v51 = vld [vmem:[%s2296_s27 + $0x30] sm:$0xff]  ;;  %v1097_v54 = vld [vmem:[%s2296_s27 + $0x48] sm:$0xff]  ;;  %v1099_v56 = vld [vmem:[%s2296_s27 + $0x58] sm:$0xff] }
  0x81   : > { %v434_v43 = vxor.u32 2147483648, %v433_v41 }
  0x82   : > { %v322_v59 = vor.u32 %v321_v57, %v320_v55  ;;  %v325_v60 = vshll.u32 %v324_v58, 23  ;;  %v1098_v55 = vld [vmem:[%s2296_s27 + $0x50] sm:$0xff]  ;;  %v1100_v57 = vld [vmem:[%s2296_s27 + $0x60] sm:$0xff]  ;;  %v1101_v58 = vld [vmem:[%s2296_s27 + $0x68] sm:$0xff] }
  0x83   : > { %v435_v45 = vsel %vm352_vm14, %v434_v43, %v433_v41 }
  0x84   : > { %v438_v50 = vsel %vm351_vm15, %v2305_v14, %v435_v45  ;;  %v326_v61 = vor.u32 4788187, %v325_v60  ;;  %v329_v62 = vcvt.s32.f32 %v322_v59  ;;  %v336_v14 = vsel %vm2382_vm5, 0, %v334_v12  ;;  %v1089_v45 = vld [vmem:[%s2296_s27 + $0x8] sm:$0xff]  ;;  %v1103_v59 = vld [vmem:[%s2296_s27 + $0x78] sm:$0xff] }
  0x85   : > { %1990 = vcosq.f32 %v438_v50  ;;  %v546_v26 = vadd.s32 3, %v336_v14  ;;  %v340_v28 = vand.u32 3, %v336_v14  ;;  %v780_v60 = vand.u32 2139095040, %v2309_v16 }
  0x86   : > { %1992 = vsinq.f32 %v438_v50  ;;  %v327_v1 = vand.u32 2147483647, %v326_v61  ;;  %v1093_v50 = vld [vmem:[%s2296_s27 + $0x28] sm:$0xff]  ;;  %v677_v61 = vand.u32 2139095040, %v2307_v15 }
  0x87   : > { %v547_v27 = vand.u32 3, %v546_v26  ;;  %vm345_vm11 = vcmp.eq.s32.totalorder %v340_v28, 2  ;;  %vm342_vm13 = vcmp.eq.s32.totalorder %v340_v28, 0  ;;  %vm341_vm15 = vcmp.lt.s32.totalorder %v340_v28, 2 }
  0x88   : > { %v330_v0 = vmul.f32 %v329_v62, %v327_v1  ;;  %v781_v62 = vshrl.u32 %v780_v60, 23  ;;  %v678_v47 = vshrl.u32 %v677_v61, 23 }
  0x89   : > { %vm552_vm12 = vcmp.eq.s32.totalorder %v547_v27, 2  ;;  %vm549_vm14 = vcmp.eq.s32.totalorder %v547_v27, 0  ;;  %vm548_vm1 = vcmp.lt.s32.totalorder %v547_v27, 2 }
  0x8a   : > { %v331_v9 = vxor.u32 2147483648, %v330_v0  ;;  %v1751_v63 = vadd.s32 4294967169, %v781_v62  ;;  %v1747_v1 = vadd.s32 4294967169, %v678_v47 }
  0x8c   : > { %v332_v17 = vsel %vm249_vm2, %v331_v9, %v330_v0  ;;  %vm339_vm2 = vweird.f32 %v2313_v20  ;;  %v787_v0 = vadd.s32 1, %v1751_v63 }
  0x8d   : > { %v335_v21 = vsel %vm2382_vm5, %v2313_v20, %v332_v17  ;;  %v1091_v20 = vld [vmem:[%s2296_s27 + $0x18] sm:$0xff]  ;;  %v777_v17 = vand.u32 2147483647, %v2309_v16 }
  0x8e   : > { %1994 = vcosq.f32 %v335_v21 }
  0x8f   : > { %1996 = vsinq.f32 %v335_v21 }
  0x92   : > { %v1991_v2 = vpop.eup %1990 }
  0x93   : > { %v1993_v5 = vpop.eup %1992  ;;  %v449_v8 = vxor.u32 2147483648, %v1991_v2 }
  0x94   : > { %v446_v10 = vxor.u32 2147483648, %v1993_v5 }
  0x95   : > { %v450_v11 = vsel %vm448_vm3, %v449_v8, %v1993_v5  ;;  %v658_v13 = vsel %vm656_vm4, %v449_v8, %v1993_v5  ;;  %vm788_vm3 = vcmp.gt.s32.totalorder %v787_v0, 0 }
  0x96   : > { %v447_v42 = vsel %vm445_vm6, %v1991_v2, %v446_v10  ;;  %v655_v19 = vsel %vm653_vm7, %v1991_v2, %v446_v10  ;;  %v684_v2 = vadd.s32 1, %v1747_v1  ;;  %v789_v3 = vsel %vm788_vm3, %v787_v0, 0 }
  0x97   : > { %v451_v22 = vsel %vm444_vm8, %v447_v42, %v450_v11  ;;  %v659_v23 = vsel %vm652_vm9, %v655_v19, %v658_v13  ;;  %v791_v4 = vand.u32 31, %v789_v3  ;;  %v2455_v12 = vshrl.u32 %v789_v3, 5 }
  0x98   : > { %v452_v24 = vsel %vm442_vm10, nan, %v451_v22  ;;  %v660_v25 = vsel %vm442_vm10, nan, %v659_v23  ;;  %vm685_vm4 = vcmp.gt.s32.totalorder %v684_v2, 0  ;;  %vm778_vm3 = vcmp.le.f32.partialorder %v777_v17, 0.7853982 }
  0x99   : > { %1840 = vmatprep.subr.mxu0 %v452_v24  ;;  %1868 = vmatprep.subr.mxu1 %v660_v25  ;;  %v686_v5 = vsel %vm685_vm4, %v684_v2, 0  ;;  %v2444_v9 = vsub.s32 32, %v791_v4  ;;  %v806_v11 = vshll.u32 %v2156_v39, %v791_v4  ;;  %v803_v21 = vshll.u32 %v2155_v37, %v791_v4 }
  0x9a   : > { %1841 = vmatpush3.msra.mxu0 %v452_v24  ;;  %1869 = vmatpush3.msra.mxu1 %v660_v25  ;;  %v688_v8 = vand.u32 31, %v686_v5  ;;  %v2452_v42 = vshrl.u32 %v686_v5, 5  ;;  %v784_v25 = vand.u32 8388607, %v777_v17  ;;  %v794_v14 = vshll.u32 %v2152_v31, %v791_v4 }
  0x9b   : > { %v1995_v29 = vpop.eup %1994  ;;  %v807_v13 = vshrl.u32 %v2157_v48, %v2444_v9  ;;  %v804_v22 = vshrl.u32 %v2156_v39, %v2444_v9  ;;  %v795_v26 = vshrl.u32 %v2153_v33, %v2444_v9  ;;  %v797_v28 = vshll.u32 %v2153_v33, %v791_v4 }
  0x9c   : > { %v1997_v30 = vpop.eup %1996  ;;  %v346_v32 = vxor.u32 2147483648, %v1995_v29  ;;  %v2446_v10 = vsub.s32 32, %v688_v8  ;;  %v703_v19 = vshll.u32 %v2156_v39, %v688_v8  ;;  %v700_v27 = vshll.u32 %v2155_v37, %v688_v8 }
  0x9d   : > { %v343_v34 = vxor.u32 2147483648, %v1997_v30  ;;  %v808_v24 = vor.u32 %v807_v13, %v806_v11  ;;  %vm709_vm5 = vcmp.lt.s32.totalorder %v2452_v42, 4  ;;  %vm809_vm6 = vcmp.lt.s32.totalorder %v2455_v12, 1 }
  0x9e   : > { %v347_v36 = vsel %vm345_vm11, %v346_v32, %v1997_v30  ;;  %v554_v38 = vsel %vm552_vm12, %v346_v32, %v1997_v30  ;;  %v704_v23 = vshrl.u32 %v2157_v48, %v2446_v10  ;;  %v798_v30 = vshrl.u32 %v2154_v35, %v2444_v9 }
  0x9f   : > { %v344_v40 = vsel %vm342_vm13, %v1995_v29, %v343_v34  ;;  %v551_v41 = vsel %vm549_vm14, %v1995_v29, %v343_v34  ;;  %v701_v29 = vshrl.u32 %v2156_v39, %v2446_v10  ;;  %v800_v48 = vshll.u32 %v2154_v35, %v791_v4 }
  0xa0   : > { %v348_v6 = vsel %vm341_vm15, %v344_v40, %v347_v36  ;;  %v555_v7 = vsel %vm548_vm1, %v551_v41, %v554_v38  ;;  %v801_v32 = vshrl.u32 %v2155_v37, %v2444_v9  ;;  %v674_v34 = vand.u32 2147483647, %v2307_v15 }
  0xa1   : > { %v349_v43 = vsel %vm339_vm2, nan, %v348_v6  ;;  %v556_v44 = vsel %vm339_vm2, nan, %v555_v7  ;;  %v805_v36 = vor.u32 %v804_v22, %v803_v21  ;;  %v691_v38 = vshll.u32 %v2152_v31, %v688_v8 }
  0xa2   : > { %1842 = vmatprep.subr.mxu0 %v349_v43  ;;  %1870 = vmatprep.subr.mxu1 %v556_v44  ;;  %v692_v40 = vshrl.u32 %v2153_v33, %v2446_v10  ;;  %v694_v39 = vshll.u32 %v2153_v33, %v688_v8  ;;  %v695_v41 = vshrl.u32 %v2154_v35, %v2446_v10  ;;  %vm811_vm7 = vcmp.lt.s32.totalorder %v2455_v12, 3 }
  0xa3   : > { %1843 = vmatpush3.msra.mxu0 %v349_v43  ;;  %1871 = vmatpush3.msra.mxu1 %v556_v44  ;;  %v697_v6 = vshll.u32 %v2154_v35, %v688_v8  ;;  %v698_v7 = vshrl.u32 %v2155_v37, %v2446_v10  ;;  %v705_v43 = vor.u32 %v704_v23, %v703_v19  ;;  %vm810_vm8 = vcmp.lt.s32.totalorder %v2455_v12, 2 }
  0xa4   : > { %1845 = vmatmul.mubr.msk.f32.vlgmr.msra.gmra.mxu0 %vm1104_vm0, %v1089_v45  ;;  %1873 = vmatmul.mubr.msk.f32.vlgmr.msra.gmra.mxu1 %vm1104_vm0, %v1089_v45  ;;  %v796_v44 = vor.u32 %v795_v26, %v794_v14  ;;  %v702_v45 = vor.u32 %v701_v29, %v700_v27  ;;  %v693_v37 = vor.u32 %v692_v40, %v691_v38  ;;  %vm706_vm9 = vcmp.lt.s32.totalorder %v2452_v42, 1 }
  0xa5   : > { %1847 = vmatprep.mubr.msk.f32.mxu0 %vm1104_vm0, %v1090_v46  ;;  %1875 = vmatprep.mubr.msk.f32.mxu1 %vm1104_vm0, %v1090_v46  ;;  %v799_v46 = vor.u32 %v798_v30, %v797_v28  ;;  %vm708_vm10 = vcmp.lt.s32.totalorder %v2452_v42, 3  ;;  %vm707_vm11 = vcmp.lt.s32.totalorder %v2452_v42, 2  ;;  %v793_v8 = vshrl.u32 %v2152_v31, %v2444_v9 }
  0xa6   : > { %v690_v23 = vshrl.u32 %v2152_v31, %v2446_v10  ;;  %v2158_v42 = vmov 0.0   ;;  %vm779_vm1 = vcmp.lt.s32.totalorder %v2309_v16, 0  ;;  %vm676_vm2 = vcmp.lt.s32.totalorder %v2307_v15, 0 }
  0xa7   : > { %v813_v9 = vsel %vm809_vm6, %v793_v8, %v796_v44  ;;  %232 = vst [vmem:[%s2571_s28] sm:$0xf] %v2158_v42  ;;  %233 = vst [vmem:[%s2571_s28 + $0x4] sm:$0xf] %v2158_v42  ;;  %vm675_vm4 = vcmp.le.f32.partialorder %v674_v34, 0.7853982 }
  0xa8   : > { %1848 = vmatmul.mubr.msk.f32.gmra.mxu0 %vm1104_vm0, %v1091_v20  ;;  %1876 = vmatmul.mubr.msk.f32.gmra.mxu1 %vm1104_vm0, %v1091_v20  ;;  %v802_v20 = vor.u32 %v801_v32, %v800_v48  ;;  %v710_v28 = vsel %vm706_vm9, %v690_v23, %v693_v37 }
  0xa9   : > { %1850 = vmatprep.mubr.msk.f32.mxu0 %vm1104_vm0, %v1092_v49  ;;  %1878 = vmatprep.mubr.msk.f32.mxu1 %vm1104_vm0, %v1092_v49  ;;  %v681_v49 = vand.u32 8388607, %v674_v34 }
  0xac   : > { %1851 = vmatmul.mubr.msk.f32.gmra.mxu0 %vm1104_vm0, %v1093_v50  ;;  %1879 = vmatmul.mubr.msk.f32.gmra.mxu1 %vm1104_vm0, %v1093_v50  ;;  %v785_v50 = vor.u32 8388608, %v784_v25 }
  0xad   : > { %1853 = vmatprep.mubr.msk.f32.mxu0 %vm1104_vm0, %v1094_v51  ;;  %1881 = vmatprep.mubr.msk.f32.mxu1 %vm1104_vm0, %v1094_v51  ;;  %v696_v51 = vor.u32 %v695_v41, %v694_v39 }
  0xaf   : > { %v714_v60 = vsel %vm706_vm9, %v693_v37, %v696_v51 }
  0xb0   : > { %1854 = vmatmul.mubr.msk.f32.gmra.mxu0 %vm1104_vm0, %v1095_v52  ;;  %1882 = vmatmul.mubr.msk.f32.gmra.mxu1 %vm1104_vm0, %v1095_v52  ;;  %v699_v52 = vor.u32 %v698_v7, %v697_v6 }
  0xb1   : > { %1856 = vmatprep.mubr.msk.f32.mxu0 %vm1104_vm0, %v1096_v53  ;;  %1884 = vmatprep.mubr.msk.f32.mxu1 %vm1104_vm0, %v1096_v53  ;;  %v715_v53 = vsel %vm709_vm5, %v702_v45, 920167782 }
  0xb2   : > { %v716_v61 = vsel %vm708_vm10, %v699_v52, %v715_v53  ;;  %v718_v47 = vsel %vm706_vm9, %v696_v51, %v699_v52  ;;  %v711_v14 = vsel %vm709_vm5, %v699_v52, 2102212464 }
  0xb3   : > { %v717_v2 = vsel %vm707_vm11, %v714_v60, %v716_v61  ;;  %v712_v27 = vsel %vm708_vm10, %v696_v51, %v711_v14 }
  0xb4   : > { %1857 = vmatmul.mubr.msk.f32.gmra.mxu0 %vm1104_vm0, %v1097_v54  ;;  %1885 = vmatmul.mubr.msk.f32.gmra.mxu1 %vm1104_vm0, %v1097_v54  ;;  %v817_v54 = vsel %vm809_vm6, %v796_v44, %v799_v46  ;;  %v713_v29 = vsel %vm707_vm11, %v710_v28, %v712_v27 }
  0xb5   : > { %1859 = vmatprep.mubr.msk.f32.mxu0 %vm1104_vm0, %v1098_v55  ;;  %1887 = vmatprep.mubr.msk.f32.mxu1 %vm1104_vm0, %v1098_v55 }
  0xb8   : > { %1860 = vmatmul.mubr.msk.f32.gmra.mxu0 %vm1104_vm0, %v1099_v56  ;;  %1888 = vmatmul.mubr.msk.f32.gmra.mxu1 %vm1104_vm0, %v1099_v56  ;;  %v682_v56 = vor.u32 8388608, %v681_v49 }
  0xb9   : > { %1862 = vmatprep.mubr.msk.f32.mxu0 %vm1104_vm0, %v1100_v57  ;;  %1890 = vmatprep.mubr.msk.f32.mxu1 %vm1104_vm0, %v1100_v57  ;;  %v719_v57 = vsel %vm709_vm5, %v705_v43, 1326507024 }
  0xba   : > { %v720_v63 = vsel %vm708_vm10, %v702_v45, %v719_v57  ;;  %v722_v0 = vshll.u32 %v682_v56, 8 }
  0xbb   : > { %v721_v5 = vsel %vm707_vm11, %v718_v47, %v720_v63 }
  0xbc   : > { %1863 = vmatmul.mubr.msk.f32.gmra.mxu0 %vm1104_vm0, %v1101_v58  ;;  %1891 = vmatmul.mubr.msk.f32.gmra.mxu1 %vm1104_vm0, %v1101_v58  ;;  %v821_v58 = vsel %vm809_vm6, %v799_v46, %v802_v20  ;;  %v2538_v21 = vmul.u32.u64.low %v722_v0, %v717_v2  ;;  %v2539_v22 = vmul.u32.u64.high %v722_v0, %v717_v2, %v2538_v21 }
  0xbd   : > { %1865 = vmatprep.mubr.msk.f32.mxu0 %vm1104_vm0, %v1102_v18  ;;  %1893 = vmatprep.mubr.msk.f32.mxu1 %vm1104_vm0, %v1102_v18 }
  0xbe   : > { %v732_v30 = vadd.s32 1, %v2539_v22 }
  0xc0   : > { %1866 = vmatmul.mubr.msk.f32.gmra.mxu0 %vm1104_vm0, %v1103_v59  ;;  %1894 = vmatmul.mubr.msk.f32.gmra.mxu1 %vm1104_vm0, %v1103_v59  ;;  %vm812_vm0 = vcmp.lt.s32.totalorder %v2455_v12, 4  ;;  %v825_v59 = vshll.u32 %v785_v50, 8 }
  0xc1   : > { %v818_v33 = vsel %vm812_vm0, %v805_v36, 920167782  ;;  %v822_v35 = vsel %vm812_vm0, %v808_v24, 1326507024  ;;  %v814_v19 = vsel %vm812_vm0, %v802_v20, 2102212464 }
  0xc2   : > { %v819_v55 = vsel %vm811_vm7, %v802_v20, %v818_v33  ;;  %v823_v18 = vsel %vm811_vm7, %v805_v36, %v822_v35  ;;  %v2543_v24 = vmul.u32.u64.low %v722_v0, %v721_v5  ;;  %v2544_v25 = vmul.u32.u64.high %v722_v0, %v721_v5, %v2543_v24 }
  0xc3   : > { %v820_v62 = vsel %vm810_vm8, %v817_v54, %v819_v55  ;;  %v824_v1 = vsel %vm810_vm8, %v821_v58, %v823_v18  ;;  %v815_v26 = vsel %vm811_vm7, %v799_v46, %v814_v19  ;;  %v729_v36 = vmul.u32 %v722_v0, %v713_v29 }
  0xc4   : > { %v2526_v3 = vmul.u32.u64.low %v825_v59, %v820_v62  ;;  %v2527_v4 = vmul.u32.u64.high %v825_v59, %v820_v62, %v2526_v3  ;;  %v2533_v11 = vmul.u32.u64.low %v825_v59, %v824_v1  ;;  %v2534_v13 = vmul.u32.u64.high %v825_v59, %v824_v1, %v2533_v11 }
  0xc5   : > { %v816_v31 = vsel %vm810_vm8, %v813_v9, %v815_v26  ;;  %vm731_vm13 = vc.u32 %v2544_v25, %v2538_v21 }
  0xc6   : > { %v835_v10 = vadd.s32 1, %v2527_v4  ;;  %vm834_vm12 = vc.u32 %v2534_v13, %v2526_v3  ;;  %v832_v48 = vmul.u32 %v825_v59, %v816_v31  ;;  %v733_v38 = vsel %vm731_vm13, %v732_v30, %v2539_v22 }
  0xc7   : > { %v734_v40 = vadd.s32 %v733_v38, %v729_v36  ;;  %v833_v57 = vadd.s32 %v2526_v3, %v2534_v13  ;;  %v730_v59 = vadd.s32 %v2538_v21, %v2544_v25 }
  0xc8   : > { %v836_v32 = vsel %vm834_vm12, %v835_v10, %v2527_v4 }
  0xc9   : > { %v837_v12 = vadd.s32 %v836_v32, %v832_v48  ;;  %v735_v41 = vadd.s32 536870912, %v734_v40 }
  0xcb   : > { %v838_v39 = vadd.s32 536870912, %v837_v12  ;;  %v2569_v7 = vshrl.u32 %v735_v41, 30 }
  0xcd   : > { %v2566_v6 = vshrl.u32 %v838_v39, 30  ;;  %v737_v44 = vshll.u32 %v2569_v7, 30  ;;  %v760_v31 = vsub.s32 4, %v2569_v7 }
  0xcf   : > { %v840_v43 = vshll.u32 %v2566_v6, 30  ;;  %v738_v46 = vsub.s32 %v734_v40, %v737_v44  ;;  %v863_v27 = vsub.s32 4, %v2566_v6  ;;  %v761_v17 = vsel %vm676_vm2, %v760_v31, %v2569_v7 }
  0xd0   : > { %v763_v30 = vsel %vm675_vm4, 0, %v761_v17 }
  0xd1   : > { %v841_v45 = vsub.s32 %v837_v12, %v840_v43  ;;  %v740_v49 = vsub.s32 0, %v738_v46  ;;  %v864_v10 = vsel %vm779_vm1, %v863_v27, %v2566_v6  ;;  %v973_v12 = vadd.s32 3, %v763_v30 }
  0xd2   : > { %v866_v29 = vsel %vm778_vm3, 0, %v864_v10 }
  0xd3   : > { %v843_v20 = vsub.s32 0, %v841_v45  ;;  %v1748_v33 = vmin.u32 %v740_v49, %v738_v46  ;;  %v1077_v32 = vadd.s32 3, %v866_v29  ;;  %v870_v43 = vand.u32 3, %v866_v29 }
  0xd4   : > { %v974_v49 = vand.u32 3, %v973_v12 }
  0xd5   : > { %v1752_v50 = vmin.u32 %v843_v20, %v841_v45  ;;  %v742_v37 = vclz %v1748_v33  ;;  %v1078_v6 = vand.u32 3, %v1077_v32  ;;  %v767_v20 = vand.u32 3, %v763_v30 }
  0xd6   : > { %vm872_vm0 = vcmp.eq.s32.totalorder %v870_v43, 0  ;;  %vm875_vm5 = vcmp.eq.s32.totalorder %v870_v43, 2  ;;  %vm871_vm8 = vcmp.lt.s32.totalorder %v870_v43, 2  ;;  %vm976_vm12 = vcmp.eq.s32.totalorder %v974_v49, 0 }
  0xd7   : > { %v845_v35 = vclz %v1752_v50  ;;  %v1749_v52 = vadd.s32 4294967294, %v742_v37  ;;  %vm1080_vm6 = vcmp.eq.s32.totalorder %v1078_v6, 0  ;;  %vm1083_vm7 = vcmp.eq.s32.totalorder %v1078_v6, 2 }
  0xd8   : > { %vm1079_vm9 = vcmp.lt.s32.totalorder %v1078_v6, 2  ;;  %vm769_vm10 = vcmp.eq.s32.totalorder %v767_v20, 0  ;;  %vm772_vm11 = vcmp.eq.s32.totalorder %v767_v20, 2  ;;  %vm979_vm13 = vcmp.eq.s32.totalorder %v974_v49, 2 }
  0xd9   : > { %v1753_v51 = vadd.s32 4294967294, %v845_v35  ;;  %vm1750_vm15 = vcmp.lt.s32.totalorder %v1749_v52, 0 }
  0xda   : > { %v745_v54 = vsel %vm1750_vm15, 0, %v1749_v52  ;;  %vm975_vm15 = vcmp.lt.s32.totalorder %v974_v49, 2 }
  0xdb   : > { %vm1754_vm14 = vcmp.lt.s32.totalorder %v1753_v51, 0  ;;  %v750_v56 = vsub.s32 4294967266, %v745_v54  ;;  %v746_v60 = vsub.s32 32, %v745_v54  ;;  %v747_v1 = vshll.u32 %v738_v46, %v745_v54 }
  0xdc   : > { %v848_v53 = vsel %vm1754_vm14, 0, %v1753_v51  ;;  %vm768_vm14 = vcmp.lt.s32.totalorder %v767_v20, 2 }
  0xdd   : > { %v853_v55 = vsub.s32 4294967266, %v848_v53  ;;  %v849_v58 = vsub.s32 32, %v848_v53  ;;  %v751_v61 = vadd.s32 127, %v750_v56  ;;  %v850_v62 = vshll.u32 %v841_v45, %v848_v53 }
  0xde   : > { %v748_v0 = vshrl.u32 %v730_v59, %v746_v60 }
  0xdf   : > { %v854_v18 = vadd.s32 127, %v853_v55  ;;  %v851_v47 = vshrl.u32 %v833_v57, %v849_v58  ;;  %v752_v2 = vshll.u32 %v751_v61, 23 }
  0xe0   : > { %v749_v8 = vor.u32 %v748_v0, %v747_v1 }
  0xe1   : > { %v855_v63 = vshll.u32 %v854_v18, 23  ;;  %v852_v4 = vor.u32 %v851_v47, %v850_v62  ;;  %v753_v11 = vor.u32 4788187, %v752_v2 }
  0xe2   : > { %v756_v3 = vcvt.s32.f32 %v749_v8 }
  0xe3   : > { %v856_v5 = vor.u32 4788187, %v855_v63  ;;  %v859_v22 = vcvt.s32.f32 %v852_v4  ;;  %v754_v23 = vand.u32 2147483647, %v753_v11 }
  0xe5   : > { %v857_v19 = vand.u32 2147483647, %v856_v5  ;;  %v757_v24 = vmul.f32 %v756_v3, %v754_v23 }
  0xe7   : > { %v860_v13 = vmul.f32 %v859_v22, %v857_v19  ;;  %v758_v21 = vxor.u32 2147483648, %v757_v24 }
  0xe9   : > { %v861_v14 = vxor.u32 2147483648, %v860_v13  ;;  %v759_v9 = vsel %vm676_vm2, %v758_v21, %v757_v24  ;;  %vm766_vm2 = vweird.f32 %v2307_v15 }
  0xea   : > { %v762_v28 = vsel %vm675_vm4, %v2307_v15, %v759_v9  ;;  %vm1518_vm4 = vcmask 1042434  }
  0xeb   : > { %v862_v25 = vsel %vm779_vm1, %v861_v14, %v860_v13  ;;  %vm869_vm1 = vweird.f32 %v2309_v16 }
  0xec   : > { %v865_v26 = vsel %vm778_vm3, %v2309_v16, %v862_v25  ;;  %vm1516_vm3 = vcmask 1041409  }
  0xed   : > { %1998 = vcosq.f32 %v865_v26 }
  0xee   : > { %2000 = vsinq.f32 %v865_v26 }
  0xef   : > { %2002 = vcosq.f32 %v762_v28 }
  0xf0   : > { %2004 = vsinq.f32 %v762_v28 }
  0xfa   : > { %v1999_v40 = vpop.eup %1998 }
  0xfb   : > { %v2001_v39 = vpop.eup %2000  ;;  %v876_v33 = vxor.u32 2147483648, %v1999_v40 }
  0xfc   : > { %v2003_v44 = vpop.eup %2002  ;;  %v873_v50 = vxor.u32 2147483648, %v2001_v39 }
  0xfd   : > { %v2005_v7 = vpop.eup %2004  ;;  %v773_v52 = vxor.u32 2147483648, %v2003_v44  ;;  %v877_v56 = vsel %vm875_vm5, %v876_v33, %v2001_v39  ;;  %v1085_v58 = vsel %vm1083_vm7, %v876_v33, %v2001_v39 }
  0xfe   : > { %v770_v51 = vxor.u32 2147483648, %v2005_v7  ;;  %v874_v55 = vsel %vm872_vm0, %v1999_v40, %v873_v50  ;;  %v1082_v57 = vsel %vm1080_vm6, %v1999_v40, %v873_v50  ;;  %vm1520_vm0 = vcmask 1043459  }
  0xff   : > { %v774_v61 = vsel %vm772_vm11, %v773_v52, %v2005_v7  ;;  %v981_v47 = vsel %vm979_vm13, %v773_v52, %v2005_v7  ;;  %v878_v0 = vsel %vm871_vm8, %v874_v55, %v877_v56  ;;  %v1086_v2 = vsel %vm1079_vm9, %v1082_v57, %v1085_v58 }
 0x100   : > { %v771_v60 = vsel %vm769_vm10, %v2003_v44, %v770_v51  ;;  %v978_v62 = vsel %vm976_vm12, %v2003_v44, %v770_v51  ;;  %v2623_v19 = vsel %vm869_vm1, nan, %v878_v0  ;;  %v2625_v22 = vsel %vm869_vm1, nan, %v1086_v2 }
 0x101   : > { %v775_v8 = vsel %vm768_vm14, %v771_v60, %v774_v61  ;;  %v982_v11 = vsel %vm975_vm15, %v978_v62, %v981_v47 }
 0x102   : > { %v2627_v14 = vsel %vm766_vm2, nan, %v775_v8  ;;  %v2629_v16 = vsel %vm766_vm2, nan, %v982_v11 }
 0x164   : > { %v1846_v34 = vpop.f32.mrf.mxu0  ;;  %v1874_v48 = vpop.f32.mrf.mxu1 }
 0x166   : > { %v2591_v36 = vpop.f32.mrf.mxu0  ;;  %v2593_v38 = vpop.f32.mrf.mxu1 }
 0x168   : > { %v2595_v41 = vpop.f32.mrf.mxu0  ;;  %v2597_v42 = vpop.f32.mrf.mxu1 }
 0x16a   : > { %v2599_v45 = vpop.f32.mrf.mxu0  ;;  %v2601_v46 = vpop.f32.mrf.mxu1 }
 0x16c   : > { %v2603_v35 = vpop.f32.mrf.mxu0  ;;  %v2605_v37 = vpop.f32.mrf.mxu1 }
 0x16e   : > { %v2607_v53 = vpop.f32.mrf.mxu0  ;;  %v2609_v54 = vpop.f32.mrf.mxu1 }
 0x170   : > { %v2611_v18 = vpop.f32.mrf.mxu0  ;;  %v2613_v59 = vpop.f32.mrf.mxu1 }
 0x172   : > { %v2615_v63 = vpop.f32.mrf.mxu0  ;;  %v2617_v1 = vpop.f32.mrf.mxu1 }
 0x174   : > { %v1858_v4 = vpop.f32.mrf.mxu0  ;;  %v1886_v5 = vpop.f32.mrf.mxu1 }
 0x175   : > { %v1452_v23 = vsub.f32 %v1858_v4, %v1874_v48  ;;  %v1444_v3 = vadd.f32 %v1886_v5, %v1846_v34 }
 0x176   : > { %v1259_v13 = vpop.f32.mrf.mxu0  ;;  %v1404_v24 = vpop.f32.mrf.mxu1 }
 0x177   : > { %v1469_v21 = vmul.f32 %v1452_v23, %v2625_v22  ;;  %v1528_v25 = vmul.f32 %v1452_v23, %v2623_v19  ;;  %v1451_v15 = vsub.f32 %v1259_v13, %v2593_v38  ;;  %v1443_v9 = vadd.f32 %v1404_v24, %v2591_v36 }
 0x178   : > { %v1861_v26 = vpop.f32.mrf.mxu0  ;;  %v1889_v28 = vpop.f32.mrf.mxu1  ;;  %v1461_v27 = vmul.f32 %v1444_v3, %v2623_v19  ;;  %v1536_v31 = vmul.f32 %v1444_v3, %v2625_v22 }
 0x179   : > { %v1454_v10 = vsub.f32 %v1861_v26, %v2597_v42  ;;  %v1446_v17 = vadd.f32 %v1889_v28, %v2595_v41  ;;  %v1468_v29 = vmul.f32 %v1451_v15, %v2629_v16  ;;  %v1527_v30 = vmul.f32 %v1451_v15, %v2627_v14 }
 0x17a   : > { %v1460_v34 = vmul.f32 %v1443_v9, %v2627_v14  ;;  %v1535_v48 = vmul.f32 %v1443_v9, %v2629_v16  ;;  %v1269_v32 = vpop.f32.mrf.mxu0  ;;  %v1414_v36 = vpop.f32.mrf.mxu1  ;;  %v1477_v20 = vadd.f32 %v1469_v21, %v1461_v27  ;;  %v1544_v49 = vsub.f32 %v1528_v25, %v1536_v31 }
 0x17b   : > { %v1471_v38 = vmul.f32 %v1454_v10, %v2625_v22  ;;  %v1530_v12 = vmul.f32 %v1454_v10, %v2623_v19  ;;  %v1463_v40 = vmul.f32 %v1446_v17, %v2623_v19  ;;  %v1538_v39 = vmul.f32 %v1446_v17, %v2625_v22 }
 0x17c   : > { %v1476_v42 = vadd.f32 %v1468_v29, %v1460_v34  ;;  %v1543_v41 = vsub.f32 %v1527_v30, %v1535_v48  ;;  %v1453_v43 = vsub.f32 %v1269_v32, %v2601_v46  ;;  %v1445_v6 = vadd.f32 %v1414_v36, %v2599_v45  ;;  %v1864_v44 = vpop.f32.mrf.mxu0  ;;  %v1892_v7 = vpop.f32.mrf.mxu1 }
 0x17d   : > { %v1456_v51 = vsub.f32 %v1864_v44, %v2605_v37  ;;  %v1448_v52 = vadd.f32 %v1892_v7, %v2603_v35  ;;  %v1479_v60 = vadd.f32 %v1471_v38, %v1463_v40  ;;  %v1546_v61 = vsub.f32 %v1530_v12, %v1538_v39 }
 0x17e   : > { %v1470_v50 = vmul.f32 %v1453_v43, %v2629_v16  ;;  %v1529_v33 = vmul.f32 %v1453_v43, %v2627_v14  ;;  %v1279_v55 = vpop.f32.mrf.mxu0  ;;  %v1424_v56 = vpop.f32.mrf.mxu1  ;;  %v1462_v57 = vmul.f32 %v1445_v6, %v2627_v14  ;;  %v1537_v46 = vmul.f32 %v1445_v6, %v2629_v16 }
 0x17f   : > { %v1484_v58 = vadd.f32 %v1477_v20, %v1476_v42  ;;  %v1551_v45 = vadd.f32 %v1544_v49, %v1543_v41  ;;  %v1455_v0 = vsub.f32 %v1279_v55, %v2609_v54  ;;  %v1447_v2 = vadd.f32 %v1424_v56, %v2607_v53 }
 0x180   : > { %v1478_v62 = vadd.f32 %v1470_v50, %v1462_v57  ;;  %v1545_v47 = vsub.f32 %v1529_v33, %v1537_v46  ;;  %v1473_v37 = vmul.f32 %v1456_v51, %v2625_v22  ;;  %v1532_v35 = vmul.f32 %v1456_v51, %v2623_v19  ;;  %v1867_v24 = vpop.f32.mrf.mxu0  ;;  %v1895_v53 = vpop.f32.mrf.mxu1 }
 0x181   : > { %v1465_v4 = vmul.f32 %v1448_v52, %v2623_v19  ;;  %v1540_v5 = vmul.f32 %v1448_v52, %v2625_v22  ;;  %v1472_v23 = vmul.f32 %v1455_v0, %v2629_v16  ;;  %v1531_v3 = vmul.f32 %v1455_v0, %v2627_v14 }
 0x182   : > { %v1491_v8 = vadd.f32 %v1479_v60, %v1478_v62  ;;  %v1558_v11 = vadd.f32 %v1546_v61, %v1545_v47  ;;  %v1464_v13 = vmul.f32 %v1447_v2, %v2627_v14  ;;  %v1539_v54 = vmul.f32 %v1447_v2, %v2629_v16  ;;  %v1289_v34 = vpop.f32.mrf.mxu0  ;;  %v1434_v48 = vpop.f32.mrf.mxu1 }
 0x183   : > { %v1481_v21 = vadd.f32 %v1473_v37, %v1465_v4  ;;  %v1548_v25 = vsub.f32 %v1532_v35, %v1540_v5  ;;  %v1485_v26 = vrot.slane %v1484_v58, 4  ;;  %v1552_v28 = vrot.slane %v1551_v45, 4 }
 0x184   : > { %v1480_v15 = vadd.f32 %v1472_v23, %v1464_v13  ;;  %v1547_v9 = vsub.f32 %v1531_v3, %v1539_v54  ;;  %v1492_v27 = vrot.slane %v1491_v8, 4  ;;  %v1559_v31 = vrot.slane %v1558_v11, 4 }
 0x185   : > { %v1458_v29 = vsub.f32 %v1867_v24, %v2613_v59  ;;  %v1450_v30 = vadd.f32 %v1895_v53, %v2611_v18  ;;  %v1486_v38 = vadd.f32 %v1485_v26, %v1484_v58  ;;  %v1553_v12 = vadd.f32 %v1552_v28, %v1551_v45 }
 0x186   : > { %v1498_v10 = vadd.f32 %v1481_v21, %v1480_v15  ;;  %v1565_v17 = vadd.f32 %v1548_v25, %v1547_v9  ;;  %v1493_v40 = vadd.f32 %v1492_v27, %v1491_v8  ;;  %v1560_v39 = vadd.f32 %v1559_v31, %v1558_v11 }
 0x187   : > { %v1457_v43 = vsub.f32 %v1289_v34, %v2617_v1  ;;  %v1449_v6 = vadd.f32 %v1434_v48, %v2615_v63  ;;  %v1475_v44 = vmul.f32 %v1458_v29, %v2625_v22  ;;  %v1534_v59 = vmul.f32 %v1458_v29, %v2623_v19  ;;  %v1459_v29 = vld [vmem:[%s2571_s28] sm:$0xf]  ;;  %v1795_v34 = vld [vmem:[%s2571_s28 + $0x4] sm:$0xf] }
 0x188   : > { %v1499_v32 = vrot.slane %v1498_v10, 4  ;;  %v1566_v36 = vrot.slane %v1565_v17, 4  ;;  %v1467_v18 = vmul.f32 %v1450_v30, %v2623_v19  ;;  %v1542_v7 = vmul.f32 %v1450_v30, %v2625_v22 }
 0x189   : > { %v1474_v20 = vmul.f32 %v1457_v43, %v2629_v16  ;;  %v1533_v49 = vmul.f32 %v1457_v43, %v2627_v14  ;;  %v1494_v50 = vrot.slane %v1493_v40, 2  ;;  %v1561_v33 = vrot.slane %v1560_v39, 2 }
 0x18a   : > { %v1500_v42 = vadd.f32 %v1499_v32, %v1498_v10  ;;  %v1567_v41 = vadd.f32 %v1566_v36, %v1565_v17  ;;  %v1466_v51 = vmul.f32 %v1449_v6, %v2627_v14  ;;  %v1541_v1 = vmul.f32 %v1449_v6, %v2629_v16 }
 0x18b   : > { %v1487_v52 = vrot.slane %v1486_v38, 2  ;;  %v1554_v63 = vrot.slane %v1553_v12, 2  ;;  %v1483_v57 = vadd.f32 %v1475_v44, %v1467_v18  ;;  %v1550_v46 = vsub.f32 %v1534_v59, %v1542_v7 }
 0x18c   : > { %v1501_v55 = vrot.slane %v1500_v42, 2  ;;  %v1568_v56 = vrot.slane %v1567_v41, 2  ;;  %v1482_v58 = vadd.f32 %v1474_v20, %v1466_v51  ;;  %v1549_v19 = vsub.f32 %v1533_v49, %v1541_v1 }
 0x18d   : > { %v1495_v45 = vadd.f32 %v1494_v50, %v1493_v40  ;;  %v1562_v22 = vadd.f32 %v1561_v33, %v1560_v39  ;;  %v1488_v0 = vadd.f32 %v1487_v52, %v1486_v38  ;;  %v1555_v2 = vadd.f32 %v1554_v63, %v1553_v12 }
 0x18e   : > { %v1505_v60 = vadd.f32 %v1483_v57, %v1482_v58  ;;  %v1572_v61 = vadd.f32 %v1550_v46, %v1549_v19  ;;  %v1502_v62 = vadd.f32 %v1501_v55, %v1500_v42  ;;  %v1569_v47 = vadd.f32 %v1568_v56, %v1567_v41 }
 0x18f   : > { %v1496_v35 = vrot.slane %v1495_v45, 1  ;;  %v1563_v16 = vrot.slane %v1562_v22, 1  ;;  %v1489_v23 = vrot.slane %v1488_v0, 1  ;;  %v1556_v3 = vrot.slane %v1555_v2, 1 }
 0x190   : > { %v1506_v37 = vrot.slane %v1505_v60, 4  ;;  %v1573_v14 = vrot.slane %v1572_v61, 4  ;;  %v1503_v8 = vrot.slane %v1502_v62, 1  ;;  %v1570_v11 = vrot.slane %v1569_v47, 1 }
 0x191   : > { %v1497_v24 = vadd.f32 %v1496_v35, %v1495_v45  ;;  %v1564_v53 = vadd.f32 %v1563_v16, %v1562_v22  ;;  %v1490_v26 = vadd.f32 %v1489_v23, %v1488_v0  ;;  %v1557_v28 = vadd.f32 %v1556_v3, %v1555_v2 }
 0x192   : > { %v1507_v4 = vadd.f32 %v1506_v37, %v1505_v60  ;;  %v1574_v5 = vadd.f32 %v1573_v14, %v1572_v61  ;;  %v1504_v15 = vadd.f32 %v1503_v8, %v1502_v62  ;;  %v1571_v9 = vadd.f32 %v1570_v11, %v1569_v47 }
 0x193   : > { %v1517_v10 = vsel %vm1516_vm3, %v1497_v24, %v1490_v26  ;;  %v1583_v17 = vsel %vm1516_vm3, %v1564_v53, %v1557_v28 }
 0x194   : > { %v1508_v13 = vrot.slane %v1507_v4, 2  ;;  %v1575_v54 = vrot.slane %v1574_v5, 2  ;;  %v1519_v32 = vsel %vm1518_vm4, %v1504_v15, %v1517_v10  ;;  %v1584_v36 = vsel %vm1518_vm4, %v1571_v9, %v1583_v17 }
 0x196   : > { %v1509_v21 = vadd.f32 %v1508_v13, %v1507_v4  ;;  %v1576_v25 = vadd.f32 %v1575_v54, %v1574_v5 }
 0x198   : > { %v1510_v27 = vrot.slane %v1509_v21, 1  ;;  %v1577_v31 = vrot.slane %v1576_v25, 1 }
 0x19a   : > { %v1511_v30 = vadd.f32 %v1510_v27, %v1509_v21  ;;  %v1578_v48 = vadd.f32 %v1577_v31, %v1576_v25 }
 0x19c   : > { %v1521_v38 = vsel %vm1520_vm0, %v1511_v30, %v1519_v32  ;;  %v1585_v12 = vsel %vm1520_vm0, %v1578_v48, %v1584_v36 }
 0x19d   : > { %v1523_v40 = vadd.f32 %v1521_v38, %v1459_v29  ;;  %v1587_v39 = vadd.f32 %v1795_v34, %v1585_v12 }
 0x19f   : > { %1524 = vst [vmem:[%s2571_s28] sm:$0xf] %v1523_v40  ;;  %1796 = vst [vmem:[%s2571_s28 + $0x4] sm:$0xf] %v1587_v39 }
 0x1a0   : > { %2075 = shalt.err (!%p2072_p6)
}
 0x1a1   : > { %s2076_s19 = scalar_lea.hbm %s2686_s12, 128  ;;  %s2080_s5 = scalar_lea.hbm %s2739_s2, 512 }
 0x1a2   : > { %p2077_p4 = scmp.ne.s32.totalorder %s2686_s12, %s2076_s19  ;;  %p2081_p7 = scmp.lt.s32.totalorder %s2686_s12, %s2739_s2 }
 0x1a3   : > { %p2082_p10 = scmp.lt.s32.totalorder %s2080_s5, %s2076_s19 }
 0x1a4   : > { %p2078_p0 = pnand %p2077_p4, %p2228_p9 }
 0x1a5   : > { %p2083_p8 = por %p2082_p10, %p2081_p7 }
 0x1a6   : > { %p2079_p1 = pneg %p2078_p0 }
 0x1a8   : > { %p2084_p13 = pnand %p2083_p8, %p2079_p1 }
 0x1aa   : > { %2087 = shalt.err (!%p2084_p13)
}
 0x1ab   : > { %s2160_s21 = smov 64   ;;  %s2161_s28 = smov 4  }
 0x1ac   : > { %1916 = dma.vmem_to_hbm [thread:$0]  (%p2228_p9), %s2688_s3, 128, %s2686_s12, %s1590_s30, %s2160_s21, %s2160_s21, %s2161_s28  }
 0x1ad PF: > { %p1930_p2 = scmp.ge.s32.totalorder %s2146_s14, 2  ;;  %s1619_s29 = sand.u32 1, %s2126_s9  }
 0x1ae   : > { %s1620_s7 = scalar_lea.sflag [#allocation4], %s1619_s29 }
 0x1af   : > { %p1926_p12 = pnand %p1930_p2, %p2235_p11 }
 0x1b1   : > { %p1927_p3 = pneg %p1926_p12 }
 0x1b3   : > { %2121 = dma.done.wait (%p1927_p3), %s1620_s7, 128  }
 0x1b4   : > { %2123 = vsyncadd (%p1927_p3), %s1620_s7, 4294967168  ;;  %s21_s14 = sadd.s32 1, %s2146_s14   ;;  %s2748_s9 = smov %s2130_s10 }
 0x1b5   : > { %p18_p5 = scmp.ge.s32.totalorder %s21_s14, 6   ;;  %s2749_s10 = smov %s2134_s11 }
 0x1b6   : > { %s2750_s11 = smov %s2233_s23  ;;  %s2751_s12 = smov %s2142_s13 }
 0x1b7   : > { %s2752_s13 = smov %s2754_s17  ;;  %20 = sbr.rel (!%p18_p5) target bundleno = 8 (0x8), region = 91 }
 0x1bc   :  { %1625 = vsyncpa [#allocation3], 1 }
 0x1bd   :  { %1627 = vsyncpa [#allocation3 + $0x1], 1 }
 0x1be   :  { %1628 = vsyncpa [#allocation6], 1 }
 0x1bf   :  { %1630 = vsyncpa [#allocation6 + $0x1], 1 }
 0x1c0   :  { %1631 = vsyncpa [#allocation4], 1 }
 0x1c1   :  { %1633 = vsyncpa [#allocation4 + $0x1], 1 }

</bundles_post_ra>
